<compile_context>
chip_gen: v5e
topology: v5e:2x2
jax: 0.10.0
libtpu: 0.0.40
codegen_flags: <defaults>
</compile_context>

<pallas_src>
import math
from functools import partial

import numpy as np
import jax
import jax.numpy as jnp
from jax.experimental import pallas as pl
from jax.experimental.pallas import tpu as pltpu


def _cdiv(a, b):
    return -(-a // b)


def _round_up(x, m):
    return ((x + m - 1) // m) * m


# ------------------------------------------------------------------ kernel ---
def _patch_merge_kernel(x_ref, ge_ref, go_ref, be_ref, bo_ref,
                        we_ref, wo_ref, o_ref, *, eps):
    """Fused 2x2 patch-merge + LayerNorm(4C) + Linear(4C->2C, no bias).

    x_ref  : (TH, 2, W2, 2C)  TH output rows; axis1 = row parity;
                              trailing 2C = (even-col || odd-col) channels
    ge/be  : (1, 2C)          LN gamma/beta for the even-row half  [x0|x2]
    go/bo  : (1, 2C)          LN gamma/beta for the odd-row  half  [x1|x3]
    we/wo  : (2C, Co) bf16    reduction weight halves, [in, out] layout
    o_ref  : (TH, W2, Co)
    """
    th = x_ref.shape[0]
    c2 = x_ref.shape[3]                       # 2C
    inv_n = 1.0 / (2.0 * c2)                  # 1 / 4C

    # Resident params/weights: load once, outside the row loop.
    ge = ge_ref[...]
    go = go_ref[...]
    be = be_ref[...]
    bo = bo_ref[...]
    we = we_ref[...]                          # bf16
    wo = wo_ref[...]                          # bf16

    def row_body(t, carry):
        blk = x_ref[t]                        # (2, W2, 2C)
        xe = blk[0].astype(jnp.float32)       # [x0 | x2]  (W2, 2C)
        xo = blk[1].astype(jnp.float32)       # [x1 | x3]  (W2, 2C)

        # single-pass LayerNorm statistics over the full 4C features (f32)
        s = (jnp.sum(xe, axis=-1, keepdims=True)
             + jnp.sum(xo, axis=-1, keepdims=True))
        sq = (jnp.sum(xe * xe, axis=-1, keepdims=True)
              + jnp.sum(xo * xo, axis=-1, keepdims=True))
        mean = s * inv_n
        var = jnp.maximum(sq * inv_n - mean * mean, 0.0)
        inv = jax.lax.rsqrt(var + eps)        # EUP rsqrt

        ye = ((xe - mean) * inv * ge + be).astype(we.dtype)   # bf16 MXU operand
        yo = ((xo - mean) * inv * go + bo).astype(wo.dtype)

        out = (jnp.dot(ye, we, preferred_element_type=jnp.float32)
               + jnp.dot(yo, wo, preferred_element_type=jnp.float32))  # (W2, Co)
        o_ref[t] = out.astype(o_ref.dtype)
        return carry

    jax.lax.fori_loop(0, th, row_body, 0)


def _pick_block_rows(n_rows, in_row_bytes, out_row_bytes, budget_bytes=12 << 20):
    """Output rows per grid step, sized against a VMEM budget."""
    per_row = 2 * in_row_bytes + 2 * out_row_bytes   # double-buffered in + out
    th = min(256, budget_bytes // max(per_row, 1))
    th = max(8, (th // 8) * 8)
    if n_rows > 8:
        # keep >= 2 grid steps so v7x's two TensorCores both get work
        th = min(th, _round_up(_cdiv(n_rows, 2), 8))
    th = min(th, _round_up(n_rows, 8))
    return max(8, int(th))


# ----------------------------------------------------------- module wrapper ---
class PatchMergingPallas:
    """JAX/Pallas equivalent of torchvision's PatchMerging (channels-last)."""

    def __init__(self, dim, key, eps=1e-5):
        self.dim = dim
        self.eps = eps
        k1, k2, k3 = jax.random.split(key, 3)
        c = dim
        # nn.Linear(4*dim, 2*dim, bias=False) default init, torch layout [out, in]
        bound = 1.0 / math.sqrt(4 * c)
        self.red_w = jax.random.uniform(k1, (2 * c, 4 * c), jnp.float32,
                                        -bound, bound)
        # LayerNorm(4*dim) affine params (randomized so the affine path is tested)
        self.gamma = 1.0 + 0.1 * jax.random.normal(k2, (4 * c,), jnp.float32)
        self.beta = 0.1 * jax.random.normal(k3, (4 * c,), jnp.float32)

        # --- precompute (once) even/odd-row split of LN params and weight ---
        # even-row features = [x0 | x2] -> original channel slots [0:C] ++ [2C:3C]
        # odd-row  features = [x1 | x3] -> original channel slots [C:2C] ++ [3C:4C]
        idx_even = jnp.concatenate([jnp.arange(0, c), jnp.arange(2 * c, 3 * c)])
        idx_odd = jnp.concatenate([jnp.arange(c, 2 * c), jnp.arange(3 * c, 4 * c)])
        w_t = self.red_w.T                                   # [4C, 2C], once
        self.w_even = w_t[idx_even].astype(jnp.bfloat16)     # [2C, 2C_out]
        self.w_odd = w_t[idx_odd].astype(jnp.bfloat16)
        self.g_even = self.gamma[idx_even].reshape(1, 2 * c)
        self.g_odd = self.gamma[idx_odd].reshape(1, 2 * c)
        self.b_even = self.beta[idx_even].reshape(1, 2 * c)
        self.b_odd = self.beta[idx_odd].reshape(1, 2 * c)

    def __call__(self, x):
        """x: [B, H, W, C] -> [B, ceil(H/2), ceil(W/2), 2C]"""
        B, H, W, C = x.shape
        assert C == self.dim
        if (H % 2) or (W % 2):
            # parity pad only (boundary); even H/W (the common case) copies nothing
            x = jnp.pad(x, ((0, 0), (0, H % 2), (0, W % 2), (0, 0)))
        Hp, Wp = x.shape[1], x.shape[2]
        H2, W2 = Hp // 2, Wp // 2
        co = 2 * self.dim
        c2 = 2 * C
        n_rows = B * H2

        # free row-major reinterpretation: (b, h, w, c) -> (b*H2 + h//2, h%2, w//2, (w%2)*C + c)
        xv = x.reshape(n_rows, 2, W2, c2)

        th = _pick_block_rows(
            n_rows,
            in_row_bytes=2 * Wp * C * x.dtype.itemsize,
            out_row_bytes=W2 * co * x.dtype.itemsize,
        )
        grid = (_cdiv(n_rows, th),)

        out = pl.pallas_call(
            partial(_patch_merge_kernel, eps=self.eps),
            out_shape=jax.ShapeDtypeStruct((n_rows, W2, co), x.dtype),
            grid_spec=pltpu.PrefetchScalarGridSpec(
                num_scalar_prefetch=0,
                grid=grid,
                in_specs=[
                    pl.BlockSpec((th, 2, W2, c2), lambda i: (i, 0, 0, 0)),  # input slab
                    pl.BlockSpec((1, c2), lambda i: (0, 0)),                # LN gamma even
                    pl.BlockSpec((1, c2), lambda i: (0, 0)),                # LN gamma odd
                    pl.BlockSpec((1, c2), lambda i: (0, 0)),                # LN beta even
                    pl.BlockSpec((1, c2), lambda i: (0, 0)),                # LN beta odd
                    pl.BlockSpec((c2, co), lambda i: (0, 0)),               # W even (bf16)
                    pl.BlockSpec((c2, co), lambda i: (0, 0)),               # W odd  (bf16)
                ],
                # NOTE: last dim of the output block is 2C_out; for production
                # Swin dims (>=192) this is lane-dense enough. For tiny C the
                # store is partially masked but the op stays HBM-bound anyway.
                out_specs=pl.BlockSpec((th, W2, co), lambda i: (i, 0, 0)),
            ),
            compiler_params=pltpu.CompilerParams(
                dimension_semantics=("parallel",),
                vmem_limit_bytes=32 * 1024 * 1024,
            ),
        )(xv, self.g_even, self.g_odd, self.b_even, self.b_odd,
          self.w_even, self.w_odd)
        return out.reshape(B, H2, W2, co)

    # pure-JAX reference (mirrors the torch module, f32 throughout)
    def reference(self, x):
        B, H, W, C = x.shape
        xp = jnp.pad(x, ((0, 0), (0, H % 2), (0, W % 2), (0, 0)))
        x0 = xp[:, 0::2, 0::2, :]
        x1 = xp[:, 1::2, 0::2, :]
        x2 = xp[:, 0::2, 1::2, :]
        x3 = xp[:, 1::2, 1::2, :]
        xm = jnp.concatenate([x0, x1, x2, x3], axis=-1)
        mean = jnp.mean(xm, axis=-1, keepdims=True)
        var = jnp.mean((xm - mean) ** 2, axis=-1, keepdims=True)
        xn = (xm - mean) / jnp.sqrt(var + self.eps)
        xn = xn * self.gamma + self.beta
        return xn @ self.red_w.T


# -------------------------------------------------------------------- main ---
if __name__ == "__main__":
    key = jax.random.PRNGKey(0)
    k_param, k_x = jax.random.split(key)

    # odd H/W exercises the parity-padding path; dim=32 -> 4C=128, 2C=64
    B, H, W, C = 2, 17, 17, 32
    module = PatchMergingPallas(C, k_param)
    x = jax.random.normal(k_x, (B, H, W, C), jnp.float32)

    out = jax.block_until_ready(module(x))
    ref = jax.block_until_ready(module.reference(x))

    assert out.shape == (B, (H + 1) // 2, (W + 1) // 2, 2 * C)
    # bf16 MXU operands (LN stats stay f32) -> loosened tolerance vs f32 reference
    np.testing.assert_allclose(np.asarray(out), np.asarray(ref),
                               rtol=5e-2, atol=5e-2)
    print("KERNEL_OK")
</pallas_src>

<mosaic_0001>
module attributes {stable_mosaic.version = 11 : i64} {
  func.func @_patch_merge_kernel(%arg0: i32, %arg1: memref<16x2x9x64xf32, #tpu.memory_space<vmem>>, %arg2: memref<1x64xf32, #tpu.memory_space<vmem>>, %arg3: memref<1x64xf32, #tpu.memory_space<vmem>>, %arg4: memref<1x64xf32, #tpu.memory_space<vmem>>, %arg5: memref<1x64xf32, #tpu.memory_space<vmem>>, %arg6: memref<64x64xbf16, #tpu.memory_space<vmem>>, %arg7: memref<64x64xbf16, #tpu.memory_space<vmem>>, %arg8: memref<16x9x64xf32, #tpu.memory_space<vmem>>) attributes {dimension_semantics = [#tpu.dimension_semantics<parallel>], iteration_bounds = array<i64: 2>, scalar_prefetch = 0 : i64, scratch_operands = 0 : i64, tpu.core_type = #tpu.core_type<tc>, window_params = [{transform_indices = @transform_0, window_bounds = array<i64: 16, 2, 9, 64>}, {pipeline_mode = #tpu.pipeline_mode<synchronous>, transform_indices = @transform_1, window_bounds = array<i64: 1, 64>}, {pipeline_mode = #tpu.pipeline_mode<synchronous>, transform_indices = @transform_2, window_bounds = array<i64: 1, 64>}, {pipeline_mode = #tpu.pipeline_mode<synchronous>, transform_indices = @transform_3, window_bounds = array<i64: 1, 64>}, {pipeline_mode = #tpu.pipeline_mode<synchronous>, transform_indices = @transform_4, window_bounds = array<i64: 1, 64>}, {pipeline_mode = #tpu.pipeline_mode<synchronous>, transform_indices = @transform_5, window_bounds = array<i64: 64, 64>}, {pipeline_mode = #tpu.pipeline_mode<synchronous>, transform_indices = @transform_6, window_bounds = array<i64: 64, 64>}, {transform_indices = @transform_7, window_bounds = array<i64: 16, 9, 64>}]} {
    %c0 = arith.constant 0 : index
    %c0_0 = arith.constant 0 : index
    %0 = vector.load %arg2[%c0, %c0_0] : memref<1x64xf32, #tpu.memory_space<vmem>>, vector<1x64xf32>
    %c0_1 = arith.constant 0 : index
    %c0_2 = arith.constant 0 : index
    %1 = vector.load %arg3[%c0_1, %c0_2] : memref<1x64xf32, #tpu.memory_space<vmem>>, vector<1x64xf32>
    %c0_3 = arith.constant 0 : index
    %c0_4 = arith.constant 0 : index
    %2 = vector.load %arg4[%c0_3, %c0_4] : memref<1x64xf32, #tpu.memory_space<vmem>>, vector<1x64xf32>
    %c0_5 = arith.constant 0 : index
    %c0_6 = arith.constant 0 : index
    %3 = vector.load %arg5[%c0_5, %c0_6] : memref<1x64xf32, #tpu.memory_space<vmem>>, vector<1x64xf32>
    %c0_7 = arith.constant 0 : index
    %c0_8 = arith.constant 0 : index
    %4 = vector.load %arg6[%c0_7, %c0_8] : memref<64x64xbf16, #tpu.memory_space<vmem>>, vector<64x64xbf16>
    %c0_9 = arith.constant 0 : index
    %c0_10 = arith.constant 0 : index
    %5 = vector.load %arg7[%c0_9, %c0_10] : memref<64x64xbf16, #tpu.memory_space<vmem>>, vector<64x64xbf16>
    %c0_i32 = arith.constant 0 : i32
    %c16_i32 = arith.constant 16 : i32
    %6 = arith.addi %c0_i32, %c16_i32 : i32
    %c1_i32 = arith.constant 1 : i32
    scf.for %arg9 = %c0_i32 to %6 step %c1_i32  : i32 {
      %7 = arith.index_cast %arg9 : i32 to index
      %c0_12 = arith.constant 0 : index
      %c0_13 = arith.constant 0 : index
      %c0_14 = arith.constant 0 : index
      %8 = vector.load %arg1[%7, %c0_12, %c0_13, %c0_14] : memref<16x2x9x64xf32, #tpu.memory_space<vmem>>, vector<1x2x9x64xf32>
      %9 = vector.shape_cast %8 : vector<1x2x9x64xf32> to vector<2x9x64xf32>
      %10 = vector.extract_strided_slice %9 {offsets = [0, 0, 0], sizes = [1, 9, 64], strides = [1, 1, 1]} : vector<2x9x64xf32> to vector<1x9x64xf32>
      %11 = vector.shape_cast %10 : vector<1x9x64xf32> to vector<9x64xf32>
      %12 = vector.extract_strided_slice %9 {offsets = [1, 0, 0], sizes = [1, 9, 64], strides = [1, 1, 1]} : vector<2x9x64xf32> to vector<1x9x64xf32>
      %13 = vector.shape_cast %12 : vector<1x9x64xf32> to vector<9x64xf32>
      %cst = arith.constant dense<0.000000e+00> : vector<9xf32>
      %14 = vector.multi_reduction <add>, %11, %cst [1] : vector<9x64xf32> to vector<9xf32>
      %15 = vector.shape_cast %14 : vector<9xf32> to vector<9x1xf32>
      %cst_15 = arith.constant dense<0.000000e+00> : vector<9xf32>
      %16 = vector.multi_reduction <add>, %13, %cst_15 [1] : vector<9x64xf32> to vector<9xf32>
      %17 = vector.shape_cast %16 : vector<9xf32> to vector<9x1xf32>
      %18 = arith.addf %15, %17 : vector<9x1xf32>
      %19 = arith.mulf %11, %11 : vector<9x64xf32>
      %cst_16 = arith.constant dense<0.000000e+00> : vector<9xf32>
      %20 = vector.multi_reduction <add>, %19, %cst_16 [1] : vector<9x64xf32> to vector<9xf32>
      %21 = vector.shape_cast %20 : vector<9xf32> to vector<9x1xf32>
      %22 = arith.mulf %13, %13 : vector<9x64xf32>
      %cst_17 = arith.constant dense<0.000000e+00> : vector<9xf32>
      %23 = vector.multi_reduction <add>, %22, %cst_17 [1] : vector<9x64xf32> to vector<9xf32>
      %24 = vector.shape_cast %23 : vector<9xf32> to vector<9x1xf32>
      %25 = arith.addf %21, %24 : vector<9x1xf32>
      %cst_18 = arith.constant 7.812500e-03 : f32
      %26 = vector.broadcast %cst_18 : f32 to vector<9x1xf32>
      %27 = arith.mulf %18, %26 : vector<9x1xf32>
      %cst_19 = arith.constant 7.812500e-03 : f32
      %28 = vector.broadcast %cst_19 : f32 to vector<9x1xf32>
      %29 = arith.mulf %25, %28 : vector<9x1xf32>
      %30 = arith.mulf %27, %27 : vector<9x1xf32>
      %31 = arith.subf %29, %30 : vector<9x1xf32>
      %cst_20 = arith.constant 0.000000e+00 : f32
      %32 = vector.broadcast %cst_20 : f32 to vector<9x1xf32>
      %33 = arith.maximumf %31, %32 : vector<9x1xf32>
      %cst_21 = arith.constant 9.99999974E-6 : f32
      %34 = vector.broadcast %cst_21 : f32 to vector<9x1xf32>
      %35 = arith.addf %33, %34 : vector<9x1xf32>
      %36 = math.rsqrt %35 : vector<9x1xf32>
      %37 = vector.broadcast %27 : vector<9x1xf32> to vector<9x64xf32>
      %38 = arith.subf %11, %37 : vector<9x64xf32>
      %39 = vector.broadcast %36 : vector<9x1xf32> to vector<9x64xf32>
      %40 = arith.mulf %38, %39 : vector<9x64xf32>
      %41 = vector.broadcast %0 : vector<1x64xf32> to vector<9x64xf32>
      %42 = arith.mulf %40, %41 : vector<9x64xf32>
      %43 = vector.broadcast %2 : vector<1x64xf32> to vector<9x64xf32>
      %44 = arith.addf %42, %43 : vector<9x64xf32>
      %45 = arith.truncf %44 : vector<9x64xf32> to vector<9x64xbf16>
      %46 = vector.broadcast %27 : vector<9x1xf32> to vector<9x64xf32>
      %47 = arith.subf %13, %46 : vector<9x64xf32>
      %48 = vector.broadcast %36 : vector<9x1xf32> to vector<9x64xf32>
      %49 = arith.mulf %47, %48 : vector<9x64xf32>
      %50 = vector.broadcast %1 : vector<1x64xf32> to vector<9x64xf32>
      %51 = arith.mulf %49, %50 : vector<9x64xf32>
      %52 = vector.broadcast %3 : vector<1x64xf32> to vector<9x64xf32>
      %53 = arith.addf %51, %52 : vector<9x64xf32>
      %54 = arith.truncf %53 : vector<9x64xf32> to vector<9x64xbf16>
      %cst_22 = arith.constant dense<0.000000e+00> : vector<9x64xf32>
      %55 = tpu.matmul %45, %4, %cst_22 {dimension_numbers = #tpu.dot_dimension_numbers<[1], [0], [0], [1], [0, 0, 1, 1], [], []>} : vector<9x64xbf16>, vector<64x64xbf16>, vector<9x64xf32> -> vector<9x64xf32>
      %cst_23 = arith.constant dense<0.000000e+00> : vector<9x64xf32>
      %56 = tpu.matmul %54, %5, %cst_23 {dimension_numbers = #tpu.dot_dimension_numbers<[1], [0], [0], [1], [0, 0, 1, 1], [], []>} : vector<9x64xbf16>, vector<64x64xbf16>, vector<9x64xf32> -> vector<9x64xf32>
      %57 = arith.addf %55, %56 : vector<9x64xf32>
      %58 = arith.index_cast %arg9 : i32 to index
      %c0_24 = arith.constant 0 : index
      %c0_25 = arith.constant 0 : index
      %59 = vector.load %arg8[%58, %c0_24, %c0_25] : memref<16x9x64xf32, #tpu.memory_space<vmem>>, vector<1x9x64xf32>
      %60 = vector.shape_cast %59 : vector<1x9x64xf32> to vector<9x64xf32>
      %61 = vector.shape_cast %57 : vector<9x64xf32> to vector<1x9x64xf32>
      tpu.vector_store %arg8[%58, %c0_24, %c0_25], %61 {strides = array<i32>} : memref<16x9x64xf32, #tpu.memory_space<vmem>>, vector<1x9x64xf32>,
    }
    %c16_i32_11 = arith.constant 16 : i32
    return
  }
  func.func @transform_0(%arg0: i32) -> (i32, i32, i32, i32) {
    %c0_i32 = arith.constant 0 : i32
    %c0_i32_0 = arith.constant 0 : i32
    %c0_i32_1 = arith.constant 0 : i32
    %c0_i32_2 = arith.constant 0 : i32
    return %arg0, %c0_i32, %c0_i32_0, %c0_i32_1 : i32, i32, i32, i32
  }
  func.func @transform_1(%arg0: i32) -> (i32, i32) {
    %c0_i32 = arith.constant 0 : i32
    %c0_i32_0 = arith.constant 0 : i32
    %c0_i32_1 = arith.constant 0 : i32
    return %c0_i32, %c0_i32_0 : i32, i32
  }
  func.func @transform_2(%arg0: i32) -> (i32, i32) {
    %c0_i32 = arith.constant 0 : i32
    %c0_i32_0 = arith.constant 0 : i32
    %c0_i32_1 = arith.constant 0 : i32
    return %c0_i32, %c0_i32_0 : i32, i32
  }
  func.func @transform_3(%arg0: i32) -> (i32, i32) {
    %c0_i32 = arith.constant 0 : i32
    %c0_i32_0 = arith.constant 0 : i32
    %c0_i32_1 = arith.constant 0 : i32
    return %c0_i32, %c0_i32_0 : i32, i32
  }
  func.func @transform_4(%arg0: i32) -> (i32, i32) {
    %c0_i32 = arith.constant 0 : i32
    %c0_i32_0 = arith.constant 0 : i32
    %c0_i32_1 = arith.constant 0 : i32
    return %c0_i32, %c0_i32_0 : i32, i32
  }
  func.func @transform_5(%arg0: i32) -> (i32, i32) {
    %c0_i32 = arith.constant 0 : i32
    %c0_i32_0 = arith.constant 0 : i32
    %c0_i32_1 = arith.constant 0 : i32
    return %c0_i32, %c0_i32_0 : i32, i32
  }
  func.func @transform_6(%arg0: i32) -> (i32, i32) {
    %c0_i32 = arith.constant 0 : i32
    %c0_i32_0 = arith.constant 0 : i32
    %c0_i32_1 = arith.constant 0 : i32
    return %c0_i32, %c0_i32_0 : i32, i32
  }
  func.func @transform_7(%arg0: i32) -> (i32, i32, i32) {
    %c0_i32 = arith.constant 0 : i32
    %c0_i32_0 = arith.constant 0 : i32
    %c0_i32_1 = arith.constant 0 : i32
    return %arg0, %c0_i32, %c0_i32_0 : i32, i32, i32
  }
}

</mosaic_0001>

<bundles_post_ra>
// kernel: tpu_custom_call.1
= control target key start
LH: loop header
LB: loop body
LE: loop exit
PB: predicated region body
PF: predicated region fallthrough
CT: control target
= control target key end

     0   :  { %s1195_s24 = smov 0   ;;  %s1197_s25 = smov 0   ;;  %s1546_s0 = inlined_call_operand.vmem [shape: f32[18,2,9,64], index: 0, kind: input, shape index: {}]   ;;  %s1547_s1 = inlined_call_operand.vmem [shape: f32[1,64], index: 1, kind: input, shape index: {}]   ;;  %s1548_s2 = inlined_call_operand.vmem [shape: f32[1,64], index: 2, kind: input, shape index: {}]   ;;  %s1549_s3 = inlined_call_operand.vmem [shape: f32[1,64], index: 3, kind: input, shape index: {}]   ;;  %s1550_s4 = inlined_call_operand.vmem [shape: f32[1,64], index: 4, kind: input, shape index: {}]   ;;  %s1551_s5 = inlined_call_operand.vmem [shape: bf16[64,64], index: 5, kind: input, shape index: {}]   ;;  %s1552_s6 = inlined_call_operand.vmem [shape: bf16[64,64], index: 6, kind: input, shape index: {}]   ;;  %s1553_s7 = inlined_call_operand.vmem [shape: f32[18,9,64], index: 7, kind: output, shape index: {}]  }
   0x1   :  { %s1199_s26 = smov 0  }
   0x2 LB: > { %s1206_s27 = sadd.s32 4294967295, %s1117_s26   ;;  %s1208_s28 = sadd.s32 1, %s1117_s26   ;;  %s1117_s26 = sphi %s1199_s26, %s1562_s26   ;;  %s1113_s25 = sphi %s1197_s25, %s1561_s25   ;;  %s1109_s24 = sphi %s1195_s24, %s1560_s24  }
   0x3   : > { %s173_s29 = ssub.s32 %s1117_s26, %s1208_s28  ;;  %s176_s30 = sadd.s32 1, %s1113_s25 }
   0x4   : > { %p174_p0 = scmp.eq.s32.totalorder %s173_s29, 0  ;;  %p186_p1 = scmp.ne.s32.totalorder %s1113_s25, %s1109_s24 }
   0x5   : > { %p187_p2 = scmp.eq.s32.totalorder %s1206_s27, 1  ;;  %p884_p3 = scmp.ge.s32.totalorder %s1117_s26, 1 }
   0x6   : > { %s1215_s8 = scalar_select %p174_p0, %s1113_s25, %s176_s30  }
   0x7   : > { %p1217_p4 = por %p187_p2, %p186_p1  ;;  %p251_p5 = scmp.lt.s32.totalorder %s1117_s26, 3 }
   0x9   : > { %p252_p6 = pnand %p884_p3, %p251_p5 }
   0xa   : > { %s286_s10 = sand.u32 (!%p252_p6), 1, %s1109_s24   ;;  %s1222_s11 = sshll.u32 (!%p252_p6), %s1206_s27, 4 }
   0xb   : > { %255 = sbr.rel (%p252_p6) target bundleno = 403 (0x193), region = 48  ;;  %s885_s16 = sshll.u32 (!%p252_p6), %s286_s10, 8 }
   0xc   : > { %p296_p7 = scmp.lt.s32.totalorder (!%p252_p6), %s1222_s11, 17  ;;  %s1331_s30 = scalar_lea.vmem (!%p252_p6), [#allocation2], %s885_s16  }
   0xd   : > { %s1333_s12 = smov (!%p252_p6), 0  }
  0x10   : > { %v1227_v0 = vld [vmem:[%s1547_s1] sm:$0x1]  ;;  %v1253_v5 = vld [vmem:[%s1551_s5] sm:$0xf0]  ;;  %s297_s26 = scalar_select %p296_p7, %s1222_s11, 17 }
  0x11   : > { %v1232_v1 = vld [vmem:[%s1548_s2] sm:$0x1]  ;;  %v1259_v6 = vld [vmem:[%s1551_s5 + $0x8] sm:$0xf]  ;;  %v1264_v7 = vld [vmem:[%s1551_s5 + $0x8] sm:$0xf0] }
  0x12   : > { %v1238_v2 = vld [vmem:[%s1549_s3] sm:$0x1]  ;;  %v1269_v8 = vld [vmem:[%s1551_s5 + $0x10] sm:$0xf]  ;;  %v1274_v9 = vld [vmem:[%s1551_s5 + $0x10] sm:$0xf0] }
  0x13   : > { %v1243_v3 = vld [vmem:[%s1550_s4] sm:$0x1]  ;;  %v1279_v10 = vld [vmem:[%s1551_s5 + $0x18] sm:$0xf]  ;;  %s945_s20 = sshll.u32 %s297_s26, 5 }
  0x14   : > { %v1248_v4 = vld [vmem:[%s1551_s5] sm:$0xf]  ;;  %v1284_v11 = vld [vmem:[%s1551_s5 + $0x18] sm:$0xf0]  ;;  %s1294_s10 = scalar_lea.vmem %s1546_s0, %s945_s20  ;;  %v1299_v13 = vld [vmem:[%s1552_s6] sm:$0xf0] }
  0x15   : > { %v1289_v12 = vld [vmem:[%s1552_s6] sm:$0xf]  ;;  %v1304_v14 = vld [vmem:[%s1552_s6 + $0x8] sm:$0xf]  ;;  %v1309_v15 = vld [vmem:[%s1552_s6 + $0x8] sm:$0xf0] }
  0x16   : > { %v1314_v16 = vld [vmem:[%s1552_s6 + $0x10] sm:$0xf]  ;;  %v1319_v17 = vld [vmem:[%s1552_s6 + $0x10] sm:$0xf0]  ;;  %v1324_v18 = vld [vmem:[%s1552_s6 + $0x18] sm:$0xf] }
  0x17   : > { %v1329_v19 = vld [vmem:[%s1552_s6 + $0x18] sm:$0xf0] }
  0x18 LB: >> { %s889_s13 = sshll.u32 %s1121_s12, 5  ;;  %vm347_vm0 = vcmask 523264   ;;  %vm351_vm1 = vcmask 516096   ;;  %v905_v39 = vor.u32 %v1329_v19, %v1324_v18  ;;  %v922_v40 = vor.u32 %v1284_v11, %v1279_v10  ;;  %s924_s16 = sshll.u32 %s1121_s12, 4  ;;  %s1121_s12 = sphi %s1333_s12, %s340_s12  }
  0x19   : >> { %s342_s26 = scalar_lea.vmem %s1294_s10, %s889_s13  ;;  %v901_v43 = vor.u32 %v1319_v17, %v1314_v16  ;;  %v918_v44 = vor.u32 %v1274_v9, %v1269_v8  ;;  %v897_v47 = vor.u32 %v1309_v15, %v1304_v14  ;;  %v914_v48 = vor.u32 %v1264_v7, %v1259_v6  ;;  %s526_s14 = scalar_lea.vmem %s1331_s30, %s924_s16 [#allocation2] }
  0x1a   : >> { %v1340_v20 = vld [vmem:[%s342_s26 + $0x10] sm:$0xff]  ;;  %v1342_v21 = vld [vmem:[%s342_s26] sm:$0xff]  ;;  %v1351_v26 = vld [vmem:[%s342_s26 + $0x18] sm:$0x1]  ;;  %474 = vmatpush.bf16.msra.mxu0 %v905_v39  ;;  %515 = vmatpush.bf16.msra.mxu1 %v922_v40  ;;  %v893_v52 = vor.u32 %v1299_v13, %v1289_v12  ;;  %v910_v55 = vor.u32 %v1253_v5, %v1248_v4  ;;  %s340_s12 = sadd.s32 1, %s1121_s12  }
  0x1b   : >> { %v355_v22 = vsel %vm347_vm0, %v1340_v20, 0.0  ;;  %v348_v23 = vsel %vm347_vm0, %v1342_v21, 0.0  ;;  %v363_v24 = vmul.f32 %v1342_v21, %v1342_v21  ;;  %v1353_v27 = vld [vmem:[%s342_s26 + $0x8] sm:$0x1]  ;;  %v358_v29 = vsel %vm351_vm1, %v1351_v26, 0.0  ;;  %p337_p8 = scmp.ge.s32.totalorder %s340_s12, 16  }
  0x1c   : >> { %356 = vadd.xlane.f32.xlu1 %v355_v22  ;;  %349 = vadd.xlane.f32.xlu0 %v348_v23  ;;  %v364_v28 = vmul.f32 %v1353_v27, %v1353_v27  ;;  %v352_v30 = vsel %vm351_vm1, %v1353_v27, 0.0  ;;  %v372_v32 = vmul.f32 %v1351_v26, %v1351_v26  ;;  %v371_v33 = vmul.f32 %v1340_v20, %v1340_v20 }
  0x1d   : >> { %v365_v25 = vsel %vm347_vm0, %v363_v24, 0.0 }
  0x1e   : >> { %366 = vadd.xlane.f32.xlu2 %v365_v25  ;;  %v368_v31 = vsel %vm351_vm1, %v364_v28, 0.0  ;;  %v376_v34 = vsel %vm351_vm1, %v372_v32, 0.0  ;;  %v373_v35 = vsel %vm347_vm0, %v371_v33, 0.0  ;;  %475 = vmatpush.bf16.msra.mxu0 %v901_v43  ;;  %v418_v43 = vperm.slane %v1227_v0, 0 }
  0x1f   : >> { %516 = vmatpush.bf16.msra.mxu1 %v918_v44 }
  0x22   : >> { %476 = vmatpush.bf16.msra.mxu0 %v897_v47  ;;  %v438_v47 = vperm.slane %v1243_v3, 0 }
  0x23   : >> { %517 = vmatpush.bf16.msra.mxu1 %v914_v48 }
  0x24   : >> { %359 = vadd.xlane.f32.xlu1 %v358_v29  ;;  %353 = vadd.xlane.f32.xlu0 %v352_v30 }
  0x26   : >> { %369 = vadd.xlane.f32.xlu2 %v368_v31  ;;  %477 = vmatpush.bf16.msra.mxu0 %v893_v52 }
  0x27   : >> { %518 = vmatpush.bf16.msra.mxu1 %v910_v55 }
  0x2c   : >> { %377 = vadd.xlane.f32.xlu1 %v376_v34  ;;  %374 = vadd.xlane.f32.xlu0 %v373_v35 }
  0x8f   : >> { %v357_v36 = vpop.xlane.xlu1 %356  ;;  %v350_v37 = vpop.xlane.xlu0 %349 }
  0x90   : >> { %v361_v45 = vadd.f32 %v357_v36, %v350_v37 }
  0x91   : >> { %v367_v38 = vpop.xlane.xlu2 %366 }
  0x92   : >> { %v381_v50 = vmul.f32 0.0078125, %v361_v45 }
  0x94   : >> { %v385_v60 = vmul.f32 %v381_v50, %v381_v50  ;;  %v413_v44 = vsub.f32 %v1342_v21, %v381_v50  ;;  %v428_v45 = vsub.f32 %v1340_v20, %v381_v50 }
  0x97   : >> { %v360_v41 = vpop.xlane.xlu1 %359  ;;  %v354_v42 = vpop.xlane.xlu0 %353 }
  0x98   : >> { %v362_v46 = vadd.f32 %v360_v41, %v354_v42  ;;  %v433_v42 = vperm.slane %v1232_v1, 0 }
  0x99   : >> { %v370_v49 = vpop.xlane.xlu2 %369 }
  0x9a   : >> { %v382_v51 = vmul.f32 0.0078125, %v362_v46 }
  0x9c   : >> { %v386_v59 = vmul.f32 %v382_v51, %v382_v51  ;;  %v429_v39 = vsub.f32 %v1351_v26, %v382_v51 }
  0x9f   : >> { %v378_v53 = vpop.xlane.xlu1 %377  ;;  %v375_v54 = vpop.xlane.xlu0 %374 }
  0xa0   : >> { %v380_v56 = vadd.f32 %v378_v53, %v370_v49  ;;  %v379_v57 = vadd.f32 %v375_v54, %v367_v38  ;;  %v414_v38 = vsub.f32 %v1353_v27, %v382_v51  ;;  %v423_v49 = vperm.slane %v1238_v2, 0 }
  0xa2   : >> { %v384_v58 = vmul.f32 0.0078125, %v380_v56  ;;  %v383_v61 = vmul.f32 0.0078125, %v379_v57 }
  0xa4   : >> { %v388_v62 = vsub.f32 %v384_v58, %v386_v59  ;;  %v387_v63 = vsub.f32 %v383_v61, %v385_v60 }
  0xa6   : >> { %v390_v22 = vmax.f32 %v388_v62, 0.0  ;;  %v389_v23 = vmax.f32 %v387_v63, 0.0 }
  0xa8   : >> { %v392_v24 = vadd.f32 1e-05, %v390_v22  ;;  %v391_v25 = vadd.f32 1e-05, %v389_v23 }
  0xaa   : >> { %1055 = vrsqrt.f32 %v392_v24  ;;  %vm409_vm4 = vweird.f32 %v392_v24  ;;  %vm399_vm6 = vweird.f32 %v391_v25 }
  0xab   : >> { %1057 = vrsqrt.f32 %v391_v25 }
  0xb0   : >> { %v1056_v28 = vpop.eup %1055 }
  0xb1   : >> { %v1058_v29 = vpop.eup %1057  ;;  %v404_v30 = vmul.f32 %v1056_v28, %v392_v24  ;;  %vm410_vm2 = vweird.f32 %v1056_v28 }
  0xb2   : >> { %v394_v31 = vmul.f32 %v1058_v29, %v391_v25  ;;  %vm400_vm3 = vweird.f32 %v1058_v29  ;;  %vm411_vm5 = vmor %vm409_vm4, %vm410_vm2 }
  0xb3   : >> { %v405_v32 = vmul.f32 %v1056_v28, %v404_v30  ;;  %vm401_vm7 = vmor %vm399_vm6, %vm400_vm3 }
  0xb4   : >> { %v395_v33 = vmul.f32 %v1058_v29, %v394_v31 }
  0xb5   : >> { %v406_v34 = vmul.f32 0.5, %v405_v32 }
  0xb6   : >> { %v396_v35 = vmul.f32 0.5, %v395_v33 }
  0xb7   : >> { %v407_v36 = vsub.f32 1.5, %v406_v34 }
  0xb8   : >> { %v397_v37 = vsub.f32 1.5, %v396_v35 }
  0xb9   : >> { %v408_v40 = vmul.f32 %v1056_v28, %v407_v36 }
  0xba   : >> { %v398_v41 = vmul.f32 %v1058_v29, %v397_v37 }
  0xbb   : >> { %v412_v46 = vsel %vm411_vm5, %v1056_v28, %v408_v40 }
  0xbc   : >> { %v402_v27 = vsel %vm401_vm7, %v1058_v29, %v398_v41  ;;  %v431_v48 = vmul.f32 %v429_v39, %v412_v46  ;;  %v416_v26 = vmul.f32 %v414_v38, %v412_v46 }
  0xbd   : >> { %v430_v51 = vmul.f32 %v428_v45, %v402_v27  ;;  %v415_v52 = vmul.f32 %v413_v44, %v402_v27 }
  0xbe   : >> { %v436_v53 = vmul.f32 %v433_v42, %v431_v48  ;;  %v421_v54 = vmul.f32 %v418_v43, %v416_v26 }
  0xbf   : >> { %v435_v55 = vmul.f32 %v433_v42, %v430_v51  ;;  %v420_v56 = vmul.f32 %v418_v43, %v415_v52 }
  0xc0   : >> { %v441_v21 = vadd.f32 %v438_v47, %v436_v53  ;;  %v426_v57 = vadd.f32 %v423_v49, %v421_v54 }
  0xc1   : >> { %v440_v20 = vadd.f32 %v438_v47, %v435_v55  ;;  %v425_v50 = vadd.f32 %v423_v49, %v420_v56 }
  0xc3   : >> { %v442_v58 = vpack.c.bf16 %v441_v21, %v440_v20  ;;  %v427_v59 = vpack.c.bf16 %v426_v57, %v425_v50 }
  0xc5   : >> { %906 = vmatmul.msk.bf16.vlgmr.msra.gmra.mxu0 %vm347_vm0, %v442_v58  ;;  %923 = vmatmul.msk.bf16.vlgmr.msra.gmra.mxu1 %vm347_vm0, %v427_v59 }
 0x142   : >> { %v479_v60 = vpop.f32.mrf.mxu0  ;;  %v520_v61 = vpop.f32.mrf.mxu1 }
 0x143   : >> { %v521_v62 = vadd.f32 %v520_v61, %v479_v60 }
 0x145   : >> { %527 = vst.msk [vmem:[%s526_s14] sm:$0xff] %vm347_vm0, %v521_v62 }
 0x149   : > { %339 = sbr.rel (!%p337_p8) target bundleno = 24 (0x18), region = 147 }
 0x14a   : >> { %v481_v63 = vpop.f32.mrf.mxu0  ;;  %v522_v22 = vpop.f32.mrf.mxu1 }
 0x14b   : >> { %v523_v23 = vadd.f32 %v522_v22, %v481_v63 }
 0x14d   : >> { %528 = vst.msk [vmem:[%s526_s14 + $0x8] sm:$0x1] %vm351_vm1, %v523_v23 }
 0x14e   : > { %535 = sbr.rel (!%p1217_p4) target bundleno = 403 (0x193), region = 59  ;;  %s537_s15 = ssub.s32 (%p1217_p4), 18, %s1222_s11 }
 0x14f   : > { %s956_s17 = sshll.u32 (%p1217_p4), %s1206_s27, 8  ;;  %p538_p9 = scmp.lt.s32.totalorder (%p1217_p4), %s537_s15, 16 }
 0x150   : > { %s1408_s20 = scalar_lea.vmem (%p1217_p4), %s1553_s7, %s956_s17  }
 0x153   : > { %s1564_s15 = smov (!%p538_p9, %s537_s15), 16 }
 0x154   : > { %s954_s21 = sshll.u32 %s1564_s15, 4  ;;  %s932_s22 = sshll.u32 %s1564_s15, 1 }
 0x155   : > { %p933_p10 = scmp.eq.s32.totalorder %s954_s21, 0 }
 0x156   : > { %s1416_s9 = sshrl.u32 (!%p933_p10), %s932_s22, 5 }
 0x157   : > { %549 = sbr.rel (%p933_p10) target bundleno = 403 (0x193), region = 63  ;;  %p934_p11 = scmp.le.s32.totalorder (!%p933_p10), %s1416_s9, 0 }
 0x15c   : > { %837 = sbr.rel (%p934_p11) target bundleno = 386 (0x182), region = 152  ;;  %s1555_s27 = smov (!%p934_p11), %s1408_s20 }
 0x15d   : > { %s1556_s11 = smov (!%p934_p11), %s1331_s30  ;;  %s1425_s10 = smov (!%p934_p11), 0  }
 0x15e   : > { %s1427_s23 = smov (!%p934_p11), 0  }
 0x161 LB: >> { %v674_v0 = vld [vmem:[%s1129_s11] sm:$0xff]  ;;  %v676_v1 = vld [vmem:[%s1129_s11 + $0x8] sm:$0xff]  ;;  %v678_v2 = vld [vmem:[%s1129_s11 + $0x10] sm:$0xff]  ;;  %s738_s24 = sadd.s32 1, %s1133_s10  ;;  %s668_s23 = sadd.s32 1, %s1137_s23   ;;  %s1137_s23 = sphi %s1427_s23, %s668_s23   ;;  %s1133_s10 = sphi %s1425_s10, %s1559_s10   ;;  %s1129_s11 = sphi %s1556_s11, %s1558_s11   ;;  %s1125_s27 = sphi %s1555_s27, %s1557_s27  }
 0x162   : >> { %675 = vst [vmem:[%s1125_s27] sm:$0xff] %v674_v0  ;;  %v680_v3 = vld [vmem:[%s1129_s11 + $0x18] sm:$0xff]  ;;  %p739_p12 = scmp.ge.s32.totalorder %s738_s24, %s1416_s9  ;;  %v682_v4 = vld [vmem:[%s1129_s11 + $0x20] sm:$0xff]  ;;  %v684_v5 = vld [vmem:[%s1129_s11 + $0x28] sm:$0xff]  ;;  %p667_p13 = scmp.ge.s32.totalorder %s668_s23, %s1416_s9 }
 0x163   : >> { %677 = vst [vmem:[%s1125_s27 + $0x8] sm:$0xff] %v676_v1  ;;  %v686_v6 = vld [vmem:[%s1129_s11 + $0x30] sm:$0xff]  ;;  %v688_v7 = vld [vmem:[%s1129_s11 + $0x38] sm:$0xff]  ;;  %v690_v8 = vld [vmem:[%s1129_s11 + $0x40] sm:$0xff] }
 0x164   : >> { %679 = vst [vmem:[%s1125_s27 + $0x10] sm:$0xff] %v678_v2  ;;  %s1566_s24 = smov (%p739_p12, %s738_s24), 0  ;;  %v692_v9 = vld [vmem:[%s1129_s11 + $0x48] sm:$0xff]  ;;  %v694_v10 = vld [vmem:[%s1129_s11 + $0x50] sm:$0xff]  ;;  %v696_v11 = vld [vmem:[%s1129_s11 + $0x58] sm:$0xff] }
 0x165   : >> { %681 = vst [vmem:[%s1125_s27 + $0x18] sm:$0xff] %v680_v3  ;;  %s935_s29 = sshll.u32 %s1566_s24, 8  ;;  %v698_v12 = vld [vmem:[%s1129_s11 + $0x60] sm:$0xff]  ;;  %v700_v13 = vld [vmem:[%s1129_s11 + $0x68] sm:$0xff]  ;;  %v702_v14 = vld [vmem:[%s1129_s11 + $0x70] sm:$0xff]  ;;  %s1559_s10 = smov %s1566_s24 }
 0x166   : >> { %683 = vst [vmem:[%s1125_s27 + $0x20] sm:$0xff] %v682_v4  ;;  %s1459_s12 = scalar_lea.vmem %s1331_s30, %s935_s29 [#allocation2]   ;;  %s1462_s13 = scalar_lea.vmem %s1408_s20, %s935_s29   ;;  %v704_v15 = vld [vmem:[%s1129_s11 + $0x78] sm:$0xff]  ;;  %v706_v16 = vld [vmem:[%s1129_s11 + $0x80] sm:$0xff]  ;;  %v708_v17 = vld [vmem:[%s1129_s11 + $0x88] sm:$0xff] }
 0x167   : >> { %685 = vst [vmem:[%s1125_s27 + $0x28] sm:$0xff] %v684_v5  ;;  %v710_v18 = vld [vmem:[%s1129_s11 + $0x90] sm:$0xff]  ;;  %v712_v19 = vld [vmem:[%s1129_s11 + $0x98] sm:$0xff]  ;;  %v714_v24 = vld [vmem:[%s1129_s11 + $0xa0] sm:$0xff] }
 0x168   : >> { %687 = vst [vmem:[%s1125_s27 + $0x30] sm:$0xff] %v686_v6  ;;  %v716_v25 = vld [vmem:[%s1129_s11 + $0xa8] sm:$0xff]  ;;  %v718_v28 = vld [vmem:[%s1129_s11 + $0xb0] sm:$0xff]  ;;  %v720_v29 = vld [vmem:[%s1129_s11 + $0xb8] sm:$0xff] }
 0x169   : >> { %689 = vst [vmem:[%s1125_s27 + $0x38] sm:$0xff] %v688_v7  ;;  %v722_v30 = vld [vmem:[%s1129_s11 + $0xc0] sm:$0xff]  ;;  %v724_v31 = vld [vmem:[%s1129_s11 + $0xc8] sm:$0xff]  ;;  %v726_v32 = vld [vmem:[%s1129_s11 + $0xd0] sm:$0xff] }
 0x16a   : >> { %691 = vst [vmem:[%s1125_s27 + $0x40] sm:$0xff] %v690_v8  ;;  %v728_v33 = vld [vmem:[%s1129_s11 + $0xd8] sm:$0xff]  ;;  %v730_v34 = vld [vmem:[%s1129_s11 + $0xe0] sm:$0xff]  ;;  %v732_v35 = vld [vmem:[%s1129_s11 + $0xe8] sm:$0xff] }
 0x16b   : >> { %693 = vst [vmem:[%s1125_s27 + $0x48] sm:$0xff] %v692_v9  ;;  %v734_v36 = vld [vmem:[%s1129_s11 + $0xf0] sm:$0xff]  ;;  %v736_v37 = vld [vmem:[%s1129_s11 + $0xf8] sm:$0xff]  ;;  %s1558_s11 = smov %s1459_s12 }
 0x16c   : >> { %695 = vst [vmem:[%s1125_s27 + $0x50] sm:$0xff] %v694_v10 }
 0x16d   : >> { %697 = vst [vmem:[%s1125_s27 + $0x58] sm:$0xff] %v696_v11 }
 0x16e   : >> { %699 = vst [vmem:[%s1125_s27 + $0x60] sm:$0xff] %v698_v12 }
 0x16f   : >> { %701 = vst [vmem:[%s1125_s27 + $0x68] sm:$0xff] %v700_v13 }
 0x170   : >> { %703 = vst [vmem:[%s1125_s27 + $0x70] sm:$0xff] %v702_v14 }
 0x171   : >> { %705 = vst [vmem:[%s1125_s27 + $0x78] sm:$0xff] %v704_v15 }
 0x172   : >> { %707 = vst [vmem:[%s1125_s27 + $0x80] sm:$0xff] %v706_v16 }
 0x173   : >> { %709 = vst [vmem:[%s1125_s27 + $0x88] sm:$0xff] %v708_v17 }
 0x174   : >> { %711 = vst [vmem:[%s1125_s27 + $0x90] sm:$0xff] %v710_v18 }
 0x175   : >> { %713 = vst [vmem:[%s1125_s27 + $0x98] sm:$0xff] %v712_v19 }
 0x176   : >> { %715 = vst [vmem:[%s1125_s27 + $0xa0] sm:$0xff] %v714_v24 }
 0x177   : >> { %717 = vst [vmem:[%s1125_s27 + $0xa8] sm:$0xff] %v716_v25 }
 0x178   : >> { %719 = vst [vmem:[%s1125_s27 + $0xb0] sm:$0xff] %v718_v28 }
 0x179   : >> { %721 = vst [vmem:[%s1125_s27 + $0xb8] sm:$0xff] %v720_v29 }
 0x17a   : >> { %723 = vst [vmem:[%s1125_s27 + $0xc0] sm:$0xff] %v722_v30 }
 0x17b   : >> { %725 = vst [vmem:[%s1125_s27 + $0xc8] sm:$0xff] %v724_v31 }
 0x17c   : >> { %727 = vst [vmem:[%s1125_s27 + $0xd0] sm:$0xff] %v726_v32 }
 0x17d   : >> { %729 = vst [vmem:[%s1125_s27 + $0xd8] sm:$0xff] %v728_v33  ;;  %670 = sbr.rel (!%p667_p13) target bundleno = 353 (0x161), region = 158 }
 0x17e   : >> { %731 = vst [vmem:[%s1125_s27 + $0xe0] sm:$0xff] %v730_v34 }
 0x17f   : >> { %733 = vst [vmem:[%s1125_s27 + $0xe8] sm:$0xff] %v732_v35 }
 0x180   : >> { %735 = vst [vmem:[%s1125_s27 + $0xf0] sm:$0xff] %v734_v36 }
 0x181   : >> { %737 = vst [vmem:[%s1125_s27 + $0xf8] sm:$0xff] %v736_v37  ;;  %s1557_s27 = smov %s1462_s13 }
 0x182 PF: > { %s1528_s26 = sand.u32 31, %s932_s22   ;;  %s957_s16 = sshll.u32 %s1416_s9, 8 }
 0x183   : > { %s749_s14 = scalar_lea.vmem %s1331_s30, %s957_s16 [#allocation2]   ;;  %s751_s17 = scalar_lea.vmem %s1408_s20, %s957_s16  }
 0x184   : > { %p940_p0 = scmp.le.s32.totalorder %s1528_s26, 0 }
 0x185   : > { %s1139_s18 = smov (!%p940_p0), %s751_s17   ;;  %s1143_s19 = smov (!%p940_p0), %s749_s14  }
 0x186   : > { %851 = sbr.rel (%p940_p0) target bundleno = 403 (0x193), region = 163  ;;  %s1147_s21 = smov (!%p940_p0), 0  }
 0x187   : > { %s1151_s24 = smov (!%p940_p0), 0  }
 0x18b LB: >> { %v761_v38 = vld [vmem:[%s1145_s19] sm:$0xff]  ;;  %s763_s15 = sadd.s32 1, %s1149_s21  ;;  %s755_s24 = sadd.s32 1, %s1153_s24   ;;  %s1153_s24 = sphi %s1151_s24, %s755_s24   ;;  %s1149_s21 = sphi %s1147_s21, %s1148_s21   ;;  %s1145_s19 = sphi %s1143_s19, %s768_s19   ;;  %s1141_s18 = sphi %s1139_s18, %s769_s18  }
 0x18c   : >> { %762 = vst [vmem:[%s1141_s18] sm:$0xff] %v761_v38  ;;  %p764_p1 = scmp.ge.s32.totalorder %s763_s15, %s1528_s26  ;;  %p754_p2 = scmp.ge.s32.totalorder %s755_s24, %s1528_s26 }
 0x18e   : >> { %s1568_s15 = smov (%p764_p1, %s763_s15), 0  ;;  %757 = sbr.rel (!%p754_p2) target bundleno = 395 (0x18b), region = 169 }
 0x18f   : >> { %s941_s30 = sshll.u32 %s1568_s15, 3  ;;  %s1148_s21 = smov %s1568_s15  }
 0x190   : >> { %s768_s19 = scalar_lea.vmem %s749_s14, %s941_s30 [#allocation2]   ;;  %s769_s18 = scalar_lea.vmem %s751_s17, %s941_s30  }
 0x193 PF: > { %p14_p3 = scmp.ge.s32.totalorder %s1208_s28, 4   ;;  %s1560_s24 = smov %s1113_s25 }
 0x194   : > { %s1561_s25 = smov %s1215_s8  ;;  %s1562_s26 = smov %s1208_s28 }
 0x195   :  { %16 = sbr.rel (!%p14_p3) target bundleno = 2 (0x2), region = 180 }

</bundles_post_ra>
